<compile_context>
chip_gen: v5e
topology: v5e:2x2
jax: 0.10.0
libtpu: 0.0.40
codegen_flags: <defaults>
</compile_context>

<pallas_src>
import functools

import jax
import jax.numpy as jnp
import numpy as np
from jax.experimental import pallas as pl
from jax.experimental.pallas import tpu as pltpu

CURV_K = 1.0  # Lorentz curvature parameter (x_t^2 - ||x_s||^2 = k)


def _round_up(v, m):
    return ((v + m - 1) // m) * m


def _lorentz_patch_kernel(feat_ref, w_ref, s_ref, t_ref, p_ref, out_ref, *,
                          kernel_len, curv_k):
    """One tile of packed patch rows.

    feat_ref : (R, pack*D)        D = C_in*P*P unfolded features per patch,
                                  `pack` patches side-by-side along lanes.
    w_ref    : (pack*D, pack*C_out)   block-diagonal linear weight (time rows 0)
    s_ref    : (pack*D, pack*C_out)   0/1 selector: sums a patch's K time lanes
                                      into each of that patch's output lanes
    t_ref    : (pack*C_out, pack*C_out) 0/1 selector: sums a patch's space
                                      output lanes (channels 1..C_out-1)
    p_ref    : (3, pack*C_out)    rows = [weight col on t_new, bias, time mask]
    out_ref  : (R, pack*C_out)    packed output (lane-dense when C_out | 128)
    """
    k = jnp.float32(curv_k)
    feat = feat_ref[...]

    # --- Lorentz direct concatenation --------------------------------------
    # Per-patch sum of clamp(t, sqrt(k))^2 over the K kernel positions,
    # broadcast to that patch's output lanes via a 0/1 selector matmul
    # (keeps the cross-lane reduction off the VPU/XLU; MXU is idle anyway).
    q = jnp.maximum(feat, jnp.sqrt(k))
    tsum = jnp.dot(q * q, s_ref[...], preferred_element_type=jnp.float32)
    t_new = jnp.sqrt(tsum - (kernel_len - 1) * k)

    # --- Linearized LorentzFullyConnected (block-diagonal weight) ----------
    y = jnp.dot(feat, w_ref[...], preferred_element_type=jnp.float32)
    y = y + t_new * p_ref[0:1, :] + p_ref[1:2, :]

    # --- Re-project each patch's time component onto the manifold ----------
    ssum = jnp.dot(y * y, t_ref[...], preferred_element_type=jnp.float32)
    y_time = jnp.sqrt(ssum + k)

    # Arithmetic blend with an exact 0/1 mask (no iota / where needed).
    tmask = p_ref[2:3, :]
    out_ref[...] = tmask * y_time + (1.0 - tmask) * y


def lorentz_patch_embedding(x, weight, bias, *, patch_size, tile_rows=None):
    """x: (B, H, W, C_in) channels-last Lorentz points -> (B, N, C_out)."""
    B, H, W, C = x.shape
    P = patch_size
    nh, nw = H // P, W // P
    N = nh * nw
    M = B * N                       # total number of patches
    K = P * P                       # kernel positions per patch
    F = K * (C - 1)                 # space features per patch
    D = K + F                       # = C*K, unfolded feature width per patch
    C_out = weight.shape[0]
    assert weight.shape == (C_out, 1 + F)

    f32 = jnp.float32
    x = x.astype(f32)
    weight = weight.astype(f32)
    bias = bias.astype(f32)

    # Lane packing: `pack` patches side-by-side so output rows span a full
    # 128-lane vreg (unmasked stores).  pack == 1 falls back gracefully.
    pack = 128 // C_out if (C_out < 128 and 128 % C_out == 0) else 1
    align = 8 * pack                # row-tile alignment (8 sublanes after packing)

    # ---- glue: unfold (single fused transposing copy, nn.Unfold order) ----
    patches = x.reshape(B, nh, P, nw, P, C).transpose(0, 1, 3, 5, 2, 4)
    feat = patches.reshape(M, D)    # per patch: [t@K pos | c1@K | ... | c_{C-1}@K]

    # ---- row tiling --------------------------------------------------------
    if tile_rows is None:
        # Large tiles amortize pipeline overhead and fill the MXU row dim.
        # Budget against a conservative VMEM limit (v7x has only 64 MiB
        # physical / 32 MiB default scoped), and keep >= 2 grid steps when
        # there are enough rows so both v7x TensorCores get work.
        budget = 24 << 20                               # double-buffered in+out
        row_bytes = 2 * 4 * (D + C_out)
        tile_rows = min(1024, max(align, (budget // row_bytes) // align * align))
        m_al = _round_up(M, align)
        if tile_rows >= m_al:
            tile_rows = m_al // 2 if m_al >= 2 * align else m_al
    tile_rows = _round_up(max(int(tile_rows), align), align)
    M_pad = _round_up(M, tile_rows)
    if M_pad != M:
        # Zero rows stay finite in-kernel (clamp -> sqrt(k)); sliced off below.
        feat = jnp.pad(feat, ((0, M_pad - M), (0, 0)))

    R = tile_rows // pack           # packed rows per grid step (multiple of 8)
    Mp = M_pad // pack              # packed rows total
    Dp = pack * D                   # packed feature width
    Np = pack * C_out               # packed output width (128 when pack > 1)
    feat_p = feat.reshape(Mp, Dp)   # free row-major view

    # ---- packed parameters --------------------------------------------------
    eye = jnp.eye(pack, dtype=f32)
    w0 = jnp.zeros((D, C_out), f32).at[K:, :].set(weight[:, 1:].T)  # time rows 0
    s0 = jnp.zeros((D, C_out), f32).at[:K, :].set(1.0)              # time-sum sel
    t0 = jnp.zeros((C_out, C_out), f32).at[1:, :].set(1.0)          # space-norm sel
    w_bd = jnp.kron(eye, w0)        # (Dp, Np)
    s_bd = jnp.kron(eye, s0)        # (Dp, Np)
    t_bd = jnp.kron(eye, t0)        # (Np, Np)
    time_mask = (jnp.arange(Np) % C_out == 0).astype(f32)[None, :]
    params = jnp.concatenate(
        [jnp.tile(weight[:, :1].T, (1, pack)),      # row 0: weight column on t_new
         jnp.tile(bias[None, :], (1, pack)),        # row 1: bias
         time_mask],                                # row 2: time-lane mask
        axis=0)                                     # (3, Np)

    grid = (Mp // R,)
    # NOTE: the parameter operands have constant index_maps, so Pallas re-uses
    # the same block across grid steps (no per-step re-DMA); single-buffering
    # them (pl.Buffered(1)) would only save a few KiB of VMEM at these sizes.
    out = pl.pallas_call(
        functools.partial(_lorentz_patch_kernel, kernel_len=K, curv_k=CURV_K),
        out_shape=jax.ShapeDtypeStruct((Mp, Np), f32),
        grid_spec=pltpu.PrefetchScalarGridSpec(
            num_scalar_prefetch=0,
            grid=grid,
            in_specs=[
                pl.BlockSpec((R, Dp), lambda i: (i, 0)),
                pl.BlockSpec((Dp, Np), lambda i: (0, 0)),
                pl.BlockSpec((Dp, Np), lambda i: (0, 0)),
                pl.BlockSpec((Np, Np), lambda i: (0, 0)),
                pl.BlockSpec((3, Np), lambda i: (0, 0)),
            ],
            out_specs=pl.BlockSpec((R, Np), lambda i: (i, 0)),
        ),
        compiler_params=pltpu.CompilerParams(
            dimension_semantics=("parallel",)),
    )(feat_p, w_bd, s_bd, t_bd, params)

    out = out.reshape(M_pad, C_out)[:M]   # free row-major view (+ slice if padded)
    return out.reshape(B, N, C_out)


def _reference(x, weight, bias, *, patch_size):
    """Pure-JAX reference of the same forward pass (nn.Unfold column order)."""
    B, H, W, C = x.shape
    P = patch_size
    nh, nw = H // P, W // P
    K = P * P
    k = CURV_K
    xc = jnp.transpose(x, (0, 3, 1, 2))                                  # (B,C,H,W)
    pat = xc.reshape(B, C, nh, P, nw, P).transpose(0, 2, 4, 1, 3, 5)     # (B,nh,nw,C,P,P)
    pat = pat.reshape(B, nh * nw, C * K)                                 # unfold order
    p_time = pat[..., :K]
    p_space = pat[..., K:]
    t = jnp.maximum(p_time, jnp.sqrt(k))
    t_new = jnp.sqrt(jnp.sum(t * t, axis=-1, keepdims=True) - (K - 1) * k)
    feat = jnp.concatenate([t_new, p_space], axis=-1)
    y = feat @ weight.T + bias
    y_space = y[..., 1:]
    y_time = jnp.sqrt(jnp.sum(y_space * y_space, axis=-1, keepdims=True) + k)
    return jnp.concatenate([y_time, y_space], axis=-1)


if __name__ == "__main__":
    # Module config: image_size=16, patch_size=4, in_channel=4, out_channel=32
    B, IMG, P, C_IN, C_OUT = 2, 16, 4, 4, 32
    key = jax.random.PRNGKey(0)
    k_space, k_w, k_b = jax.random.split(key, 3)

    # Valid Lorentz input points: time = sqrt(||space||^2 + k)
    space = jax.random.normal(k_space, (B, IMG, IMG, C_IN - 1), dtype=jnp.float32)
    time = jnp.sqrt(jnp.sum(space * space, axis=-1, keepdims=True) + CURV_K)
    x = jnp.concatenate([time, space], axis=-1)               # (B, H, W, C_in)

    # Linearized-kernel parameters (nn.Linear style): (C_out, 1 + (C_in-1)*P*P)
    lin_features = (C_IN - 1) * P * P + 1
    weight = 0.02 * jax.random.normal(k_w, (C_OUT, lin_features), dtype=jnp.float32)
    bias = 0.02 * jax.random.normal(k_b, (C_OUT,), dtype=jnp.float32)

    emb = jax.jit(functools.partial(lorentz_patch_embedding, patch_size=P))
    out = jax.block_until_ready(emb(x, weight, bias))

    ref = _reference(x, weight, bias, patch_size=P)
    np.testing.assert_allclose(np.asarray(out), np.asarray(ref), rtol=1e-5, atol=1e-5)

    assert out.shape == (B, (IMG // P) ** 2, C_OUT)
    print("KERNEL_OK")
</pallas_src>

<mosaic_0001>
module attributes {stable_mosaic.version = 11 : i64} {
  func.func @_lorentz_patch_kernel(%arg0: i32, %arg1: memref<8x256xf32, #tpu.memory_space<vmem>>, %arg2: memref<256x128xf32, #tpu.memory_space<vmem>>, %arg3: memref<256x128xf32, #tpu.memory_space<vmem>>, %arg4: memref<128x128xf32, #tpu.memory_space<vmem>>, %arg5: memref<3x128xf32, #tpu.memory_space<vmem>>, %arg6: memref<8x128xf32, #tpu.memory_space<vmem>>) attributes {dimension_semantics = [#tpu.dimension_semantics<parallel>], iteration_bounds = array<i64: 1>, scalar_prefetch = 0 : i64, scratch_operands = 0 : i64, tpu.core_type = #tpu.core_type<tc>, window_params = [{transform_indices = @transform_0, window_bounds = array<i64: 8, 256>}, {pipeline_mode = #tpu.pipeline_mode<synchronous>, transform_indices = @transform_1, window_bounds = array<i64: 256, 128>}, {pipeline_mode = #tpu.pipeline_mode<synchronous>, transform_indices = @transform_2, window_bounds = array<i64: 256, 128>}, {pipeline_mode = #tpu.pipeline_mode<synchronous>, transform_indices = @transform_3, window_bounds = array<i64: 128, 128>}, {pipeline_mode = #tpu.pipeline_mode<synchronous>, transform_indices = @transform_4, window_bounds = array<i64: 3, 128>}, {transform_indices = @transform_5, window_bounds = array<i64: 8, 128>}]} {
    %c0 = arith.constant 0 : index
    %c0_0 = arith.constant 0 : index
    %0 = vector.load %arg1[%c0, %c0_0] : memref<8x256xf32, #tpu.memory_space<vmem>>, vector<8x256xf32>
    %cst = arith.constant 1.000000e+00 : f32
    %1 = math.sqrt %cst : f32
    %2 = vector.broadcast %1 : f32 to vector<8x256xf32>
    %3 = arith.maximumf %0, %2 : vector<8x256xf32>
    %4 = arith.mulf %3, %3 : vector<8x256xf32>
    %c0_1 = arith.constant 0 : index
    %c0_2 = arith.constant 0 : index
    %5 = vector.load %arg3[%c0_1, %c0_2] : memref<256x128xf32, #tpu.memory_space<vmem>>, vector<256x128xf32>
    %cst_3 = arith.constant dense<0.000000e+00> : vector<8x128xf32>
    %6 = tpu.matmul %4, %5, %cst_3 {dimension_numbers = #tpu.dot_dimension_numbers<[1], [0], [0], [1], [0, 0, 1, 1], [], []>} : vector<8x256xf32>, vector<256x128xf32>, vector<8x128xf32> -> vector<8x128xf32>
    %cst_4 = arith.constant 1.500000e+01 : f32
    %cst_5 = arith.constant 1.000000e+00 : f32
    %7 = arith.mulf %cst_4, %cst_5 : f32
    %8 = vector.broadcast %7 : f32 to vector<8x128xf32>
    %9 = arith.subf %6, %8 : vector<8x128xf32>
    %10 = math.sqrt %9 : vector<8x128xf32>
    %c0_6 = arith.constant 0 : index
    %c0_7 = arith.constant 0 : index
    %11 = vector.load %arg2[%c0_6, %c0_7] : memref<256x128xf32, #tpu.memory_space<vmem>>, vector<256x128xf32>
    %cst_8 = arith.constant dense<0.000000e+00> : vector<8x128xf32>
    %12 = tpu.matmul %0, %11, %cst_8 {dimension_numbers = #tpu.dot_dimension_numbers<[1], [0], [0], [1], [0, 0, 1, 1], [], []>} : vector<8x256xf32>, vector<256x128xf32>, vector<8x128xf32> -> vector<8x128xf32>
    %c0_9 = arith.constant 0 : index
    %c0_10 = arith.constant 0 : index
    %13 = vector.load %arg5[%c0_9, %c0_10] : memref<3x128xf32, #tpu.memory_space<vmem>>, vector<1x128xf32>
    %14 = vector.broadcast %13 : vector<1x128xf32> to vector<8x128xf32>
    %15 = arith.mulf %10, %14 : vector<8x128xf32>
    %16 = arith.addf %12, %15 : vector<8x128xf32>
    %c1 = arith.constant 1 : index
    %c0_11 = arith.constant 0 : index
    %17 = vector.load %arg5[%c1, %c0_11] : memref<3x128xf32, #tpu.memory_space<vmem>>, vector<1x128xf32>
    %18 = vector.broadcast %17 : vector<1x128xf32> to vector<8x128xf32>
    %19 = arith.addf %16, %18 : vector<8x128xf32>
    %20 = arith.mulf %19, %19 : vector<8x128xf32>
    %c0_12 = arith.constant 0 : index
    %c0_13 = arith.constant 0 : index
    %21 = vector.load %arg4[%c0_12, %c0_13] : memref<128x128xf32, #tpu.memory_space<vmem>>, vector<128x128xf32>
    %cst_14 = arith.constant dense<0.000000e+00> : vector<8x128xf32>
    %22 = tpu.matmul %20, %21, %cst_14 {dimension_numbers = #tpu.dot_dimension_numbers<[1], [0], [0], [1], [0, 0, 1, 1], [], []>} : vector<8x128xf32>, vector<128x128xf32>, vector<8x128xf32> -> vector<8x128xf32>
    %cst_15 = arith.constant 1.000000e+00 : f32
    %23 = vector.broadcast %cst_15 : f32 to vector<8x128xf32>
    %24 = arith.addf %22, %23 : vector<8x128xf32>
    %25 = math.sqrt %24 : vector<8x128xf32>
    %c2 = arith.constant 2 : index
    %c0_16 = arith.constant 0 : index
    %26 = vector.load %arg5[%c2, %c0_16] : memref<3x128xf32, #tpu.memory_space<vmem>>, vector<1x128xf32>
    %27 = vector.broadcast %26 : vector<1x128xf32> to vector<8x128xf32>
    %28 = arith.mulf %27, %25 : vector<8x128xf32>
    %cst_17 = arith.constant 1.000000e+00 : f32
    %29 = vector.broadcast %cst_17 : f32 to vector<1x128xf32>
    %30 = arith.subf %29, %26 : vector<1x128xf32>
    %31 = vector.broadcast %30 : vector<1x128xf32> to vector<8x128xf32>
    %32 = arith.mulf %31, %19 : vector<8x128xf32>
    %33 = arith.addf %28, %32 : vector<8x128xf32>
    %c0_18 = arith.constant 0 : index
    %c0_19 = arith.constant 0 : index
    %34 = vector.load %arg6[%c0_18, %c0_19] : memref<8x128xf32, #tpu.memory_space<vmem>>, vector<8x128xf32>
    tpu.vector_store %arg6[%c0_18, %c0_19], %33 {strides = array<i32>} : memref<8x128xf32, #tpu.memory_space<vmem>>, vector<8x128xf32>,
    return
  }
  func.func @transform_0(%arg0: i32) -> (i32, i32) {
    %c0_i32 = arith.constant 0 : i32
    %c0_i32_0 = arith.constant 0 : i32
    return %arg0, %c0_i32 : i32, i32
  }
  func.func @transform_1(%arg0: i32) -> (i32, i32) {
    %c0_i32 = arith.constant 0 : i32
    %c0_i32_0 = arith.constant 0 : i32
    %c0_i32_1 = arith.constant 0 : i32
    return %c0_i32, %c0_i32_0 : i32, i32
  }
  func.func @transform_2(%arg0: i32) -> (i32, i32) {
    %c0_i32 = arith.constant 0 : i32
    %c0_i32_0 = arith.constant 0 : i32
    %c0_i32_1 = arith.constant 0 : i32
    return %c0_i32, %c0_i32_0 : i32, i32
  }
  func.func @transform_3(%arg0: i32) -> (i32, i32) {
    %c0_i32 = arith.constant 0 : i32
    %c0_i32_0 = arith.constant 0 : i32
    %c0_i32_1 = arith.constant 0 : i32
    return %c0_i32, %c0_i32_0 : i32, i32
  }
  func.func @transform_4(%arg0: i32) -> (i32, i32) {
    %c0_i32 = arith.constant 0 : i32
    %c0_i32_0 = arith.constant 0 : i32
    %c0_i32_1 = arith.constant 0 : i32
    return %c0_i32, %c0_i32_0 : i32, i32
  }
  func.func @transform_5(%arg0: i32) -> (i32, i32) {
    %c0_i32 = arith.constant 0 : i32
    %c0_i32_0 = arith.constant 0 : i32
    return %arg0, %c0_i32 : i32, i32
  }
}

</mosaic_0001>

<bundles_post_ra>
// kernel: lorentz_patch_embedding.1
= control target key start
LH: loop header
LB: loop body
LE: loop exit
PB: predicated region body
PF: predicated region fallthrough
CT: control target
= control target key end

     0   :  { %s553_s2 = inlined_call_operand.vmem [shape: f32[256,128], index: 2, kind: input, shape index: {}]   ;;  %s554_s1 = inlined_call_operand.vmem [shape: f32[256,128], index: 1, kind: input, shape index: {}]   ;;  %s555_s0 = inlined_call_operand.vmem [shape: f32[8,256], index: 0, kind: input, shape index: {}]   ;;  %s556_s4 = inlined_call_operand.vmem [shape: f32[3,128], index: 4, kind: input, shape index: {}]   ;;  %s557_s3 = inlined_call_operand.vmem [shape: f32[128,128], index: 3, kind: input, shape index: {}]   ;;  %s558_s5 = inlined_call_operand.vmem [shape: f32[8,128], index: 5, kind: output, shape index: {}]  }
   0x1   :  { %v41_v0 = vld [vmem:[%s553_s2 + $0x78] sm:$0xff]  ;;  %v40_v2 = vld [vmem:[%s553_s2 + $0x70] sm:$0xff]  ;;  %v39_v4 = vld [vmem:[%s553_s2 + $0x68] sm:$0xff] }
   0x2   :  { %v57_v1 = vld [vmem:[%s553_s2 + $0xf8] sm:$0xff]  ;;  %58 = vmatpush.msra.mxu0 %v41_v0  ;;  %v56_v3 = vld [vmem:[%s553_s2 + $0xf0] sm:$0xff]  ;;  %v55_v5 = vld [vmem:[%s553_s2 + $0xe8] sm:$0xff] }
   0x3   :  { %78 = vmatpush.msra.mxu1 %v57_v1  ;;  %v38_v6 = vld [vmem:[%s553_s2 + $0x60] sm:$0xff]  ;;  %v37_v8 = vld [vmem:[%s553_s2 + $0x58] sm:$0xff]  ;;  %v36_v10 = vld [vmem:[%s553_s2 + $0x50] sm:$0xff] }
   0x4   :  { %59 = vmatpush.msra.mxu0 %v40_v2  ;;  %v54_v7 = vld [vmem:[%s553_s2 + $0xe0] sm:$0xff]  ;;  %v53_v9 = vld [vmem:[%s553_s2 + $0xd8] sm:$0xff]  ;;  %v52_v12 = vld [vmem:[%s553_s2 + $0xd0] sm:$0xff] }
   0x5   :  { %79 = vmatpush.msra.mxu1 %v56_v3  ;;  %v126_v11 = vld [vmem:[%s554_s1 + $0x78] sm:$0xff]  ;;  %v125_v13 = vld [vmem:[%s554_s1 + $0x70] sm:$0xff]  ;;  %v124_v15 = vld [vmem:[%s554_s1 + $0x68] sm:$0xff] }
   0x6   :  { %60 = vmatpush.msra.mxu0 %v39_v4  ;;  %146 = vmatpush.msra.mxu2 %v126_v11  ;;  %v142_v14 = vld [vmem:[%s554_s1 + $0xf8] sm:$0xff]  ;;  %v35_v16 = vld [vmem:[%s553_s2 + $0x48] sm:$0xff]  ;;  %v141_v18 = vld [vmem:[%s554_s1 + $0xf0] sm:$0xff] }
   0x7   :  { %80 = vmatpush.msra.mxu1 %v55_v5  ;;  %v51_v17 = vld [vmem:[%s553_s2 + $0xc8] sm:$0xff]  ;;  %166 = vmatpush.msra.mxu3 %v142_v14  ;;  %v123_v19 = vld [vmem:[%s554_s1 + $0x60] sm:$0xff]  ;;  %v122_v23 = vld [vmem:[%s554_s1 + $0x58] sm:$0xff] }
   0x8   :  { %61 = vmatpush.msra.mxu0 %v38_v6  ;;  %147 = vmatpush.msra.mxu2 %v125_v13  ;;  %v140_v20 = vld [vmem:[%s554_s1 + $0xe8] sm:$0xff]  ;;  %v34_v21 = vld [vmem:[%s553_s2 + $0x40] sm:$0xff]  ;;  %v33_v25 = vld [vmem:[%s553_s2 + $0x38] sm:$0xff] }
   0x9   :  { %81 = vmatpush.msra.mxu1 %v54_v7  ;;  %v50_v22 = vld [vmem:[%s553_s2 + $0xc0] sm:$0xff]  ;;  %167 = vmatpush.msra.mxu3 %v141_v18  ;;  %v49_v26 = vld [vmem:[%s553_s2 + $0xb8] sm:$0xff]  ;;  %v121_v27 = vld [vmem:[%s554_s1 + $0x50] sm:$0xff] }
   0xa   :  { %62 = vmatpush.msra.mxu0 %v37_v8  ;;  %148 = vmatpush.msra.mxu2 %v124_v15  ;;  %v139_v24 = vld [vmem:[%s554_s1 + $0xe0] sm:$0xff]  ;;  %v138_v28 = vld [vmem:[%s554_s1 + $0xd8] sm:$0xff]  ;;  %v32_v29 = vld [vmem:[%s553_s2 + $0x30] sm:$0xff] }
   0xb   :  { %82 = vmatpush.msra.mxu1 %v53_v9  ;;  %168 = vmatpush.msra.mxu3 %v140_v20  ;;  %v48_v30 = vld [vmem:[%s553_s2 + $0xb0] sm:$0xff]  ;;  %v120_v31 = vld [vmem:[%s554_s1 + $0x48] sm:$0xff]  ;;  %v119_v35 = vld [vmem:[%s554_s1 + $0x40] sm:$0xff] }
   0xc   :  { %63 = vmatpush.msra.mxu0 %v36_v10  ;;  %149 = vmatpush.msra.mxu2 %v123_v19  ;;  %v137_v32 = vld [vmem:[%s554_s1 + $0xd0] sm:$0xff]  ;;  %v31_v33 = vld [vmem:[%s553_s2 + $0x28] sm:$0xff]  ;;  %v30_v37 = vld [vmem:[%s553_s2 + $0x20] sm:$0xff] }
   0xd   :  { %83 = vmatpush.msra.mxu1 %v52_v12  ;;  %169 = vmatpush.msra.mxu3 %v139_v24  ;;  %v47_v34 = vld [vmem:[%s553_s2 + $0xa8] sm:$0xff]  ;;  %v46_v38 = vld [vmem:[%s553_s2 + $0xa0] sm:$0xff]  ;;  %v118_v41 = vld [vmem:[%s554_s1 + $0x38] sm:$0xff] }
   0xe   :  { %64 = vmatpush.msra.mxu0 %v35_v16  ;;  %150 = vmatpush.msra.mxu2 %v122_v23  ;;  %v136_v36 = vld [vmem:[%s554_s1 + $0xc8] sm:$0xff]  ;;  %v408_v39 = vld [vmem:[%s555_s0] sm:$0xff]  ;;  %v29_v43 = vld [vmem:[%s553_s2 + $0x18] sm:$0xff] }
   0xf   :  { %84 = vmatpush.msra.mxu1 %v51_v17  ;;  %170 = vmatpush.msra.mxu3 %v138_v28  ;;  %v21_v40 = vld [vmem:[%s555_s0 + $0x8] sm:$0xff]  ;;  %v135_v42 = vld [vmem:[%s554_s1 + $0xc0] sm:$0xff]  ;;  %v45_v44 = vld [vmem:[%s553_s2 + $0x98] sm:$0xff]  ;;  %v22_v49 = vmax.f32 %v408_v39, 1.0 }
  0x10   :  { %65 = vmatpush.msra.mxu0 %v34_v21  ;;  %151 = vmatpush.msra.mxu2 %v121_v27  ;;  %v117_v45 = vld [vmem:[%s554_s1 + $0x30] sm:$0xff]  ;;  %v134_v46 = vld [vmem:[%s554_s1 + $0xb8] sm:$0xff]  ;;  %v23_v50 = vmax.f32 %v21_v40, 1.0  ;;  %v116_v51 = vld [vmem:[%s554_s1 + $0x28] sm:$0xff] }
  0x11   :  { %85 = vmatpush.msra.mxu1 %v50_v22  ;;  %171 = vmatpush.msra.mxu3 %v137_v32  ;;  %v28_v47 = vld [vmem:[%s553_s2 + $0x10] sm:$0xff]  ;;  %v27_v53 = vld [vmem:[%s553_s2 + $0x8] sm:$0xff]  ;;  %v115_v55 = vld [vmem:[%s554_s1 + $0x20] sm:$0xff]  ;;  %v24_v59 = vmul.f32 %v22_v49, %v22_v49 }
  0x12   :  { %66 = vmatpush.msra.mxu0 %v33_v25  ;;  %152 = vmatpush.msra.mxu2 %v120_v31  ;;  %v44_v48 = vld [vmem:[%s553_s2 + $0x90] sm:$0xff]  ;;  %v43_v54 = vld [vmem:[%s553_s2 + $0x88] sm:$0xff]  ;;  %v26_v57 = vld [vmem:[%s553_s2] sm:$0xff]  ;;  %v25_v60 = vmul.f32 %v23_v50, %v23_v50 }
  0x13   :  { %86 = vmatpush.msra.mxu1 %v49_v26  ;;  %172 = vmatpush.msra.mxu3 %v136_v36  ;;  %v133_v52 = vld [vmem:[%s554_s1 + $0xb0] sm:$0xff]  ;;  %v132_v56 = vld [vmem:[%s554_s1 + $0xa8] sm:$0xff]  ;;  %v42_v58 = vld [vmem:[%s553_s2 + $0x80] sm:$0xff] }
  0x14   :  { %67 = vmatpush.msra.mxu0 %v32_v29  ;;  %153 = vmatpush.msra.mxu2 %v119_v35  ;;  %v114_v61 = vld [vmem:[%s554_s1 + $0x18] sm:$0xff]  ;;  %v131_v62 = vld [vmem:[%s554_s1 + $0xa0] sm:$0xff]  ;;  %v113_v63 = vld [vmem:[%s554_s1 + $0x10] sm:$0xff] }
  0x15   :  { %87 = vmatpush.msra.mxu1 %v48_v30  ;;  %173 = vmatpush.msra.mxu3 %v135_v42  ;;  %v130_v0 = vld [vmem:[%s554_s1 + $0x98] sm:$0xff]  ;;  %v112_v1 = vld [vmem:[%s554_s1 + $0x8] sm:$0xff]  ;;  %v129_v2 = vld [vmem:[%s554_s1 + $0x90] sm:$0xff] }
  0x16   :  { %68 = vmatpush.msra.mxu0 %v31_v33  ;;  %154 = vmatpush.msra.mxu2 %v118_v41  ;;  %v111_v3 = vld [vmem:[%s554_s1] sm:$0xff]  ;;  %v128_v4 = vld [vmem:[%s554_s1 + $0x88] sm:$0xff]  ;;  %v205_v6 = vld [vmem:[%s557_s3 + $0x78] sm:$0xff] }
  0x17   :  { %88 = vmatpush.msra.mxu1 %v47_v34  ;;  %174 = vmatpush.msra.mxu3 %v134_v46  ;;  %v127_v5 = vld [vmem:[%s554_s1 + $0x80] sm:$0xff]  ;;  %v204_v7 = vld [vmem:[%s557_s3 + $0x70] sm:$0xff]  ;;  %v203_v8 = vld [vmem:[%s557_s3 + $0x68] sm:$0xff] }
  0x18   :  { %69 = vmatpush.msra.mxu0 %v30_v37  ;;  %155 = vmatpush.msra.mxu2 %v117_v45  ;;  %v202_v9 = vld [vmem:[%s557_s3 + $0x60] sm:$0xff]  ;;  %v201_v10 = vld [vmem:[%s557_s3 + $0x58] sm:$0xff]  ;;  %v200_v11 = vld [vmem:[%s557_s3 + $0x50] sm:$0xff] }
  0x19   :  { %89 = vmatpush.msra.mxu1 %v46_v38  ;;  %175 = vmatpush.msra.mxu3 %v133_v52  ;;  %v199_v12 = vld [vmem:[%s557_s3 + $0x48] sm:$0xff]  ;;  %v198_v13 = vld [vmem:[%s557_s3 + $0x40] sm:$0xff]  ;;  %v197_v14 = vld [vmem:[%s557_s3 + $0x38] sm:$0xff] }
  0x1a   :  { %70 = vmatpush.msra.mxu0 %v29_v43  ;;  %156 = vmatpush.msra.mxu2 %v116_v51  ;;  %v196_v15 = vld [vmem:[%s557_s3 + $0x30] sm:$0xff]  ;;  %v195_v16 = vld [vmem:[%s557_s3 + $0x28] sm:$0xff]  ;;  %v194_v17 = vld [vmem:[%s557_s3 + $0x20] sm:$0xff] }
  0x1b   :  { %90 = vmatpush.msra.mxu1 %v45_v44  ;;  %176 = vmatpush.msra.mxu3 %v132_v56  ;;  %v193_v18 = vld [vmem:[%s557_s3 + $0x18] sm:$0xff]  ;;  %v192_v19 = vld [vmem:[%s557_s3 + $0x10] sm:$0xff]  ;;  %v191_v22 = vld [vmem:[%s557_s3 + $0x8] sm:$0xff] }
  0x1c   :  { %71 = vmatpush.msra.mxu0 %v28_v47  ;;  %157 = vmatpush.msra.mxu2 %v115_v55  ;;  %v190_v24 = vld [vmem:[%s557_s3] sm:$0xff] }
  0x1d   :  { %91 = vmatpush.msra.mxu1 %v44_v48  ;;  %177 = vmatpush.msra.mxu3 %v131_v62  ;;  %v251_v33 = vld [vmem:[%s556_s4] ss:$0 sm:$0xff]  ;;  %v252_v41 = vld [vmem:[%s556_s4 + $0x1] ss:$0 sm:$0xff]  ;;  %v238_v50 = vld [vmem:[%s556_s4 + $0x2] sm:$0x1] }
  0x1e   :  { %72 = vmatpush.msra.mxu0 %v27_v53  ;;  %158 = vmatpush.msra.mxu2 %v114_v61  ;;  %v241_v52 = vsub.f32 1.0, %v238_v50  ;;  %v253_v55 = vld [vmem:[%s556_s4 + $0x2] ss:$0 sm:$0xff] }
  0x1f   :  { %92 = vmatpush.msra.mxu1 %v43_v54  ;;  %178 = vmatpush.msra.mxu3 %v130_v0 }
  0x20   :  { %73 = vmatpush.msra.mxu0 %v26_v57  ;;  %159 = vmatpush.msra.mxu2 %v113_v63  ;;  %v242_v56 = vperm.slane %v241_v52, 0 }
  0x21   :  { %93 = vmatpush.msra.mxu1 %v42_v58  ;;  %74 = vmatmul.f32.vlgmr.msra.gmra.mxu0 %v24_v59 }
  0x22   :  { %94 = vmatmul.f32.vlgmr.msra.gmra.mxu1 %v25_v60  ;;  %160 = vmatpush.msra.mxu2 %v112_v1 }
  0x23   :  { %179 = vmatpush.msra.mxu3 %v129_v2  ;;  %206 = vmatpush.msrb.mxu0 %v205_v6 }
  0x24   :  { %161 = vmatpush.msra.mxu2 %v111_v3 }
  0x25   :  { %180 = vmatpush.msra.mxu3 %v128_v4  ;;  %162 = vmatmul.f32.vlgmr.msra.gmra.mxu2 %v408_v39 }
  0x26   :  { %207 = vmatpush.msrb.mxu0 %v204_v7 }
  0x27   :  { %181 = vmatpush.msra.mxu3 %v127_v5 }
  0x28   :  { %182 = vmatmul.f32.vlgmr.msra.gmra.mxu3 %v21_v40  ;;  %208 = vmatpush.msrb.mxu0 %v203_v8 }
  0x2a   :  { %209 = vmatpush.msrb.mxu0 %v202_v9 }
  0x2c   :  { %210 = vmatpush.msrb.mxu0 %v201_v10 }
  0x2e   :  { %211 = vmatpush.msrb.mxu0 %v200_v11 }
  0x30   :  { %212 = vmatpush.msrb.mxu0 %v199_v12 }
  0x32   :  { %213 = vmatpush.msrb.mxu0 %v198_v13 }
  0x34   :  { %214 = vmatpush.msrb.mxu0 %v197_v14 }
  0x36   :  { %215 = vmatpush.msrb.mxu0 %v196_v15 }
  0x38   :  { %216 = vmatpush.msrb.mxu0 %v195_v16 }
  0x3a   :  { %217 = vmatpush.msrb.mxu0 %v194_v17 }
  0x3c   :  { %218 = vmatpush.msrb.mxu0 %v193_v18 }
  0x3e   :  { %219 = vmatpush.msrb.mxu0 %v192_v19 }
  0x40   :  { %220 = vmatpush.msrb.mxu0 %v191_v22 }
  0x42   :  { %221 = vmatpush.msrb.mxu0 %v190_v24 }
  0x9e   :  { %v75_v20 = vpop.f32.mrf.mxu0 }
  0x9f   :  { %v95_v21 = vpop.f32.mrf.mxu1 }
  0xa0   :  { %v96_v23 = vadd.f32 %v95_v21, %v75_v20 }
  0xa2   :  { %v250_v25 = vadd.f32 -15.0, %v96_v23 }
  0xa4   :  { %254 = vrsqrt.f32 %v250_v25  ;;  %vm106_vm0 = vcmp.eq.f32.partialorder %v250_v25, inf  ;;  %v109_v34 = vand.u32 2147483648, %v250_v25  ;;  %vm108_vm1 = vcmp.eq.f32.partialorder %v250_v25, 0.0 }
  0xa8   :  { %v163_v37 = vpop.f32.mrf.mxu2 }
  0xaa   :  { %v255_v26 = vpop.eup %254 }
  0xab   :  { %v100_v27 = vmul.f32 %v255_v26, %v250_v25  ;;  %v183_v39 = vpop.f32.mrf.mxu3 }
  0xad   :  { %v101_v28 = vmul.f32 %v255_v26, %v100_v27 }
  0xaf   :  { %v102_v29 = vmul.f32 0.5, %v101_v28 }
  0xb1   :  { %v103_v30 = vsub.f32 1.5, %v102_v29 }
  0xb3   :  { %v104_v31 = vmul.f32 %v255_v26, %v103_v30 }
  0xb5   :  { %v105_v32 = vmul.f32 %v250_v25, %v104_v31 }
  0xb7   :  { %v107_v35 = vsel %vm106_vm0, %v250_v25, %v105_v32 }
  0xb8   :  { %v110_v36 = vsel %vm108_vm1, %v109_v34, %v107_v35 }
  0xb9   :  { %v145_v38 = vmul.f32 %v251_v33, %v110_v36 }
  0xbb   :  { %v164_v40 = vadd.f32 %v163_v37, %v145_v38 }
  0xbd   :  { %v184_v42 = vadd.f32 %v183_v39, %v164_v40 }
  0xbf   :  { %v188_v43 = vadd.f32 %v252_v41, %v184_v42 }
  0xc1   :  { %v189_v44 = vmul.f32 %v188_v43, %v188_v43  ;;  %v243_v61 = vmul.f32 %v242_v56, %v188_v43 }
  0xc3   :  { %222 = vmatmul.f32.vlgmr.msrb.gmra.mxu0 %v189_v44 }
 0x140   :  { %v223_v45 = vpop.f32.mrf.mxu0 }
 0x141   :  { %v224_v46 = vadd.f32 1.0, %v223_v45 }
 0x143   :  { %256 = vrsqrt.f32 %v224_v46  ;;  %vm233_vm2 = vcmp.eq.f32.partialorder %v224_v46, inf  ;;  %v236_v58 = vand.u32 2147483648, %v224_v46  ;;  %vm235_vm3 = vcmp.eq.f32.partialorder %v224_v46, 0.0 }
 0x149   :  { %v257_v47 = vpop.eup %256 }
 0x14a   :  { %v227_v48 = vmul.f32 %v257_v47, %v224_v46 }
 0x14c   :  { %v228_v49 = vmul.f32 %v257_v47, %v227_v48 }
 0x14e   :  { %v229_v51 = vmul.f32 0.5, %v228_v49 }
 0x150   :  { %v230_v53 = vsub.f32 1.5, %v229_v51 }
 0x152   :  { %v231_v54 = vmul.f32 %v257_v47, %v230_v53 }
 0x154   :  { %v232_v57 = vmul.f32 %v231_v54, %v224_v46 }
 0x156   :  { %v234_v59 = vsel %vm233_vm2, %v224_v46, %v232_v57 }
 0x157   :  { %v237_v60 = vsel %vm235_vm3, %v236_v58, %v234_v59 }
 0x158   :  { %v240_v62 = vmul.f32 %v253_v55, %v237_v60 }
 0x15a   :  { %v244_v63 = vadd.f32 %v243_v61, %v240_v62 }
 0x15c   :  { %245 = vst [vmem:[%s558_s5] sm:$0xff] %v244_v63 }

</bundles_post_ra>
